<compile_context>
chip_gen: v6e
topology: v6e:2x2x1
jax: 0.10.0
libtpu: 0.0.40
codegen_flags: <defaults>
</compile_context>

<pallas_src>
import string

import jax
import jax.numpy as jnp
from jax import lax
from jax.experimental import pallas as pl
from jax.experimental.pallas import tpu as pltpu

# ---- module hyperparameters (from the PyTorch script) ----------------------
ALL_LETTERS = string.ascii_letters + " .,;'"
N_LETTERS = len(ALL_LETTERS)        # 57  -> input_size
N_HIDDEN = 128                      # hidden_size
N_CATEGORIES = 18                   # output_size (classic char-RNN tutorial)

O_PAD = 128                         # logits padded to a full 128-lane slab
CHUNK = 8                           # timesteps per grid step (sublane-aligned)
NEG_BIG = -1e30                     # mask value for padded logit lanes


# ---- kernel 1: serial hidden recurrence, CHUNK steps per grid iteration ----
def rnn_recurrence_kernel(xb_ref, whh_ref, h0_ref, hist_ref, h_carry):
    """hist[t] = hidden at the INPUT of step t (what the output proj needs).

    xb_ref : (CHUNK, H)  precomputed  Wx_h[char_t] + b_i2h   (streamed)
    whh_ref: (H, H)      hidden-to-hidden weight              (resident)
    h0_ref : (1, H)      initial hidden                       (resident)
    h_carry: (1, H)      VMEM scratch carrying h across grid steps
    """
    @pl.when(pl.program_id(0) == 0)
    def _():
        h_carry[...] = h0_ref[...]

    h = h_carry[...]                      # (1, H) lives in vregs for the chunk
    whh = whh_ref[...]                    # (H, H) loaded once per chunk
    for t in range(CHUNK):                # static unroll: CHUNK serial steps
        hist_ref[t, :] = h[0, :]          # record h_{t} (input hidden of step t)
        h = (jnp.dot(h, whh, preferred_element_type=jnp.float32)
             + xb_ref[t][None, :])        # xb already holds Wx_h[c_t] + b_h
    h_carry[...] = h


# ---- kernel 2: deferred output projection + log_softmax (parallel over T) --
def rnn_output_kernel(hist_ref, xo_ref, who_ref, out_ref):
    """logits_t = hist[t] @ Wh_o + (Wx_o[char_t] + b_o);  then log_softmax.

    hist_ref: (CHUNK, H), xo_ref: (CHUNK, O_PAD), who_ref: (H, O_PAD) resident.
    """
    logits = (jnp.dot(hist_ref[...], who_ref[...],
                      preferred_element_type=jnp.float32)
              + xo_ref[...])                                  # (CHUNK, O_PAD)
    lane = lax.broadcasted_iota(jnp.int32, logits.shape, 1)
    logits = jnp.where(lane < N_CATEGORIES, logits, NEG_BIG)
    m = jnp.max(logits, axis=-1, keepdims=True)
    shifted = logits - m
    lse = jnp.log(jnp.sum(jnp.exp(shifted), axis=-1, keepdims=True))
    out_ref[...] = shifted - lse


# ---- wrapper: split/pack weights once, run the two passes -------------------
def rnn_sequence(char_idx, h0, w_i2h, b_i2h, w_i2o, b_i2o):
    """Run the whole sequence through the RNN.

    char_idx: (T,) int32 character indices (one-hot folded into row gathers)
    h0:       (1, 128) float32 initial hidden
    w_i2h:    (128, 185), b_i2h: (128,)     -- PyTorch nn.Linear layout
    w_i2o:    (18, 185),  b_i2o: (18,)
    returns (log_probs (T, 1, 18), final hidden (1, 128))
    """
    T = char_idx.shape[0]
    B, H = h0.shape
    I = w_i2h.shape[1] - H
    O = w_i2o.shape[0]

    # Pad time so hist[T] (== final hidden) always exists and chunks are full.
    T_pad = ((T + 1 + CHUNK - 1) // CHUNK) * CHUNK
    idx_pad = jnp.zeros((T_pad,), jnp.int32).at[:T].set(char_idx)

    # Split cat(x, h) @ W.T into x- and h- halves ONCE.
    wxh = w_i2h[:, :I].T          # (I, H)   input  -> hidden
    whh = w_i2h[:, I:].T          # (H, H)   hidden -> hidden   (serial path)
    wxo = w_i2o[:, :I].T          # (I, O)   input  -> output
    who = w_i2o[:, I:].T          # (H, O)   hidden -> output   (deferred)

    # Precomputed per-step input contribution to the recurrence (gather+bias).
    xb = jnp.take(wxh, idx_pad, axis=0) + b_i2h[None, :]         # (T_pad, H)

    # --- serial pass: hidden recurrence only ---------------------------------
    hist = pl.pallas_call(
        rnn_recurrence_kernel,
        out_shape=jax.ShapeDtypeStruct((T_pad, H), jnp.float32),
        grid=(T_pad // CHUNK,),
        in_specs=[
            pl.BlockSpec((CHUNK, H), lambda c: (c, 0)),   # xb   (streamed)
            pl.BlockSpec((H, H), lambda c: (0, 0)),       # Whh  (resident)
            pl.BlockSpec((B, H), lambda c: (0, 0)),       # h0   (resident)
        ],
        out_specs=pl.BlockSpec((CHUNK, H), lambda c: (c, 0)),
        scratch_shapes=[pltpu.VMEM((B, H), jnp.float32)],  # hidden carry
        compiler_params=pltpu.CompilerParams(
            dimension_semantics=("arbitrary",)),           # true recurrence
    )(xb, whh, h0)

    # --- parallel pass: output projection + log_softmax ----------------------
    who_pad = jnp.zeros((H, O_PAD), jnp.float32).at[:, :O].set(who)
    xo = jnp.zeros((T_pad, O_PAD), jnp.float32).at[:, :O].set(
        jnp.take(wxo, idx_pad, axis=0) + b_i2o[None, :])          # (T_pad, 128)

    out_pad = pl.pallas_call(
        rnn_output_kernel,
        out_shape=jax.ShapeDtypeStruct((T_pad, O_PAD), jnp.float32),
        grid=(T_pad // CHUNK,),
        in_specs=[
            pl.BlockSpec((CHUNK, H), lambda c: (c, 0)),       # hidden history
            pl.BlockSpec((CHUNK, O_PAD), lambda c: (c, 0)),   # Wx_o[c_t] + b_o
            pl.BlockSpec((H, O_PAD), lambda c: (0, 0)),       # Wh_o (resident)
        ],
        out_specs=pl.BlockSpec((CHUNK, O_PAD), lambda c: (c, 0)),
        compiler_params=pltpu.CompilerParams(
            dimension_semantics=("parallel",)),               # megacore on v7x
    )(hist, xo, who_pad)

    # slice padding off outside the kernels (cheap XLA slices)
    log_probs = out_pad[:T, :O].reshape(T, B, O)
    h_final = hist[T:T + 1, :]      # hidden after the last REAL step
    return log_probs, h_final


# ---- deterministic parameter init (PyTorch nn.Linear default: U(-k, k)) ----
def init_linear(key, out_features, in_features):
    k = 1.0 / jnp.sqrt(jnp.float32(in_features))
    wkey, bkey = jax.random.split(key)
    w = jax.random.uniform(wkey, (out_features, in_features),
                           minval=-k, maxval=k, dtype=jnp.float32)
    b = jax.random.uniform(bkey, (out_features,),
                           minval=-k, maxval=k, dtype=jnp.float32)
    return w, b


def line_to_indices(line):
    return jnp.array([ALL_LETTERS.find(c) for c in line], dtype=jnp.int32)


if __name__ == "__main__":
    key = jax.random.PRNGKey(0)
    k_i2h, k_i2o = jax.random.split(key)

    w_i2h, b_i2h = init_linear(k_i2h, N_HIDDEN, N_LETTERS + N_HIDDEN)
    w_i2o, b_i2o = init_linear(k_i2o, N_CATEGORIES, N_LETTERS + N_HIDDEN)

    # input = lineToTensor('ding'); the one-hot is folded into row gathers.
    line = "ding"
    char_idx = line_to_indices(line)                       # (4,)
    h0 = jnp.zeros((1, N_HIDDEN), dtype=jnp.float32)

    run = jax.jit(rnn_sequence)
    out_seq, h_final = run(char_idx, h0, w_i2h, b_i2h, w_i2o, b_i2o)
    out_seq = jax.block_until_ready(out_seq)
    h_final = jax.block_until_ready(h_final)

    # reference check in plain JAX (exact PyTorch forward semantics)
    seq = jax.nn.one_hot(char_idx, N_LETTERS, dtype=jnp.float32)[:, None, :]
    h_ref = h0
    outs_ref = []
    for t in range(seq.shape[0]):
        combined = jnp.concatenate([seq[t], h_ref], axis=1)
        h_ref = combined @ w_i2h.T + b_i2h
        outs_ref.append(jax.nn.log_softmax(combined @ w_i2o.T + b_i2o, axis=1))
    outs_ref = jnp.stack(outs_ref)

    assert out_seq.shape == (len(line), 1, N_CATEGORIES)
    assert h_final.shape == (1, N_HIDDEN)
    assert jnp.allclose(out_seq, outs_ref, atol=1e-4), "output mismatch"
    assert jnp.allclose(h_final, h_ref, atol=1e-4), "hidden mismatch"

    print("KERNEL_OK")
</pallas_src>

<mosaic_0001>
module attributes {stable_mosaic.version = 11 : i64} {
  func.func @rnn_recurrence_kernel(%arg0: i32, %arg1: memref<8x128xf32, #tpu.memory_space<vmem>>, %arg2: memref<128x128xf32, #tpu.memory_space<vmem>>, %arg3: memref<1x128xf32, #tpu.memory_space<vmem>>, %arg4: memref<8x128xf32, #tpu.memory_space<vmem>>, %arg5: memref<1x128xf32, #tpu.memory_space<vmem>>) attributes {dimension_semantics = [#tpu.dimension_semantics<arbitrary>], iteration_bounds = array<i64: 1>, scalar_prefetch = 0 : i64, scratch_operands = 1 : i64, tpu.core_type = #tpu.core_type<tc>, window_params = [{transform_indices = @transform_0, window_bounds = array<i64: 8, 128>}, {pipeline_mode = #tpu.pipeline_mode<synchronous>, transform_indices = @transform_1, window_bounds = array<i64: 128, 128>}, {pipeline_mode = #tpu.pipeline_mode<synchronous>, transform_indices = @transform_2, window_bounds = array<i64: 1, 128>}, {transform_indices = @transform_3, window_bounds = array<i64: 8, 128>}]} {
    %c0_i32 = arith.constant 0 : i32
    %0 = arith.cmpi eq, %arg0, %c0_i32 : i32
    %1 = arith.extui %0 : i1 to i32
    %c0_i32_0 = arith.constant 0 : i32
    %2 = arith.cmpi ne, %1, %c0_i32_0 : i32
    scf.if %2 {
      %c0_38 = arith.constant 0 : index
      %c0_39 = arith.constant 0 : index
      %78 = vector.load %arg3[%c0_38, %c0_39] : memref<1x128xf32, #tpu.memory_space<vmem>>, vector<1x128xf32>
      %c0_40 = arith.constant 0 : index
      %c0_41 = arith.constant 0 : index
      %79 = vector.load %arg5[%c0_40, %c0_41] : memref<1x128xf32, #tpu.memory_space<vmem>>, vector<1x128xf32>
      tpu.vector_store %arg5[%c0_40, %c0_41], %78 {strides = array<i32>} : memref<1x128xf32, #tpu.memory_space<vmem>>, vector<1x128xf32>,
    } else {
    }
    %c0 = arith.constant 0 : index
    %c0_1 = arith.constant 0 : index
    %3 = vector.load %arg5[%c0, %c0_1] : memref<1x128xf32, #tpu.memory_space<vmem>>, vector<1x128xf32>
    %c0_2 = arith.constant 0 : index
    %c0_3 = arith.constant 0 : index
    %4 = vector.load %arg2[%c0_2, %c0_3] : memref<128x128xf32, #tpu.memory_space<vmem>>, vector<128x128xf32>
    %5 = vector.shape_cast %3 : vector<1x128xf32> to vector<128xf32>
    %c0_4 = arith.constant 0 : index
    %c0_5 = arith.constant 0 : index
    %6 = vector.load %arg4[%c0_4, %c0_5] : memref<8x128xf32, #tpu.memory_space<vmem>>, vector<1x128xf32>
    %7 = vector.shape_cast %6 : vector<1x128xf32> to vector<128xf32>
    %8 = vector.shape_cast %5 : vector<128xf32> to vector<1x128xf32>
    tpu.vector_store %arg4[%c0_4, %c0_5], %8 {strides = array<i32>} : memref<8x128xf32, #tpu.memory_space<vmem>>, vector<1x128xf32>,
    %cst = arith.constant dense<0.000000e+00> : vector<1x128xf32>
    %9 = tpu.matmul %3, %4, %cst {dimension_numbers = #tpu.dot_dimension_numbers<[1], [0], [0], [1], [0, 0, 1, 1], [], []>} : vector<1x128xf32>, vector<128x128xf32>, vector<1x128xf32> -> vector<1x128xf32>
    %c0_6 = arith.constant 0 : index
    %c0_7 = arith.constant 0 : index
    %10 = vector.load %arg1[%c0_6, %c0_7] : memref<8x128xf32, #tpu.memory_space<vmem>>, vector<1x128xf32>
    %11 = vector.shape_cast %10 : vector<1x128xf32> to vector<128xf32>
    %12 = vector.shape_cast %11 : vector<128xf32> to vector<1x128xf32>
    %13 = arith.addf %9, %12 : vector<1x128xf32>
    %14 = vector.shape_cast %13 : vector<1x128xf32> to vector<128xf32>
    %c1 = arith.constant 1 : index
    %c0_8 = arith.constant 0 : index
    %15 = vector.load %arg4[%c1, %c0_8] : memref<8x128xf32, #tpu.memory_space<vmem>>, vector<1x128xf32>
    %16 = vector.shape_cast %15 : vector<1x128xf32> to vector<128xf32>
    %17 = vector.shape_cast %14 : vector<128xf32> to vector<1x128xf32>
    tpu.vector_store %arg4[%c1, %c0_8], %17 {strides = array<i32>} : memref<8x128xf32, #tpu.memory_space<vmem>>, vector<1x128xf32>,
    %cst_9 = arith.constant dense<0.000000e+00> : vector<1x128xf32>
    %18 = tpu.matmul %13, %4, %cst_9 {dimension_numbers = #tpu.dot_dimension_numbers<[1], [0], [0], [1], [0, 0, 1, 1], [], []>} : vector<1x128xf32>, vector<128x128xf32>, vector<1x128xf32> -> vector<1x128xf32>
    %c1_10 = arith.constant 1 : index
    %c0_11 = arith.constant 0 : index
    %19 = vector.load %arg1[%c1_10, %c0_11] : memref<8x128xf32, #tpu.memory_space<vmem>>, vector<1x128xf32>
    %20 = vector.shape_cast %19 : vector<1x128xf32> to vector<128xf32>
    %21 = vector.shape_cast %20 : vector<128xf32> to vector<1x128xf32>
    %22 = arith.addf %18, %21 : vector<1x128xf32>
    %23 = vector.shape_cast %22 : vector<1x128xf32> to vector<128xf32>
    %c2 = arith.constant 2 : index
    %c0_12 = arith.constant 0 : index
    %24 = vector.load %arg4[%c2, %c0_12] : memref<8x128xf32, #tpu.memory_space<vmem>>, vector<1x128xf32>
    %25 = vector.shape_cast %24 : vector<1x128xf32> to vector<128xf32>
    %26 = vector.shape_cast %23 : vector<128xf32> to vector<1x128xf32>
    tpu.vector_store %arg4[%c2, %c0_12], %26 {strides = array<i32>} : memref<8x128xf32, #tpu.memory_space<vmem>>, vector<1x128xf32>,
    %cst_13 = arith.constant dense<0.000000e+00> : vector<1x128xf32>
    %27 = tpu.matmul %22, %4, %cst_13 {dimension_numbers = #tpu.dot_dimension_numbers<[1], [0], [0], [1], [0, 0, 1, 1], [], []>} : vector<1x128xf32>, vector<128x128xf32>, vector<1x128xf32> -> vector<1x128xf32>
    %c2_14 = arith.constant 2 : index
    %c0_15 = arith.constant 0 : index
    %28 = vector.load %arg1[%c2_14, %c0_15] : memref<8x128xf32, #tpu.memory_space<vmem>>, vector<1x128xf32>
    %29 = vector.shape_cast %28 : vector<1x128xf32> to vector<128xf32>
    %30 = vector.shape_cast %29 : vector<128xf32> to vector<1x128xf32>
    %31 = arith.addf %27, %30 : vector<1x128xf32>
    %32 = vector.shape_cast %31 : vector<1x128xf32> to vector<128xf32>
    %c3 = arith.constant 3 : index
    %c0_16 = arith.constant 0 : index
    %33 = vector.load %arg4[%c3, %c0_16] : memref<8x128xf32, #tpu.memory_space<vmem>>, vector<1x128xf32>
    %34 = vector.shape_cast %33 : vector<1x128xf32> to vector<128xf32>
    %35 = vector.shape_cast %32 : vector<128xf32> to vector<1x128xf32>
    tpu.vector_store %arg4[%c3, %c0_16], %35 {strides = array<i32>} : memref<8x128xf32, #tpu.memory_space<vmem>>, vector<1x128xf32>,
    %cst_17 = arith.constant dense<0.000000e+00> : vector<1x128xf32>
    %36 = tpu.matmul %31, %4, %cst_17 {dimension_numbers = #tpu.dot_dimension_numbers<[1], [0], [0], [1], [0, 0, 1, 1], [], []>} : vector<1x128xf32>, vector<128x128xf32>, vector<1x128xf32> -> vector<1x128xf32>
    %c3_18 = arith.constant 3 : index
    %c0_19 = arith.constant 0 : index
    %37 = vector.load %arg1[%c3_18, %c0_19] : memref<8x128xf32, #tpu.memory_space<vmem>>, vector<1x128xf32>
    %38 = vector.shape_cast %37 : vector<1x128xf32> to vector<128xf32>
    %39 = vector.shape_cast %38 : vector<128xf32> to vector<1x128xf32>
    %40 = arith.addf %36, %39 : vector<1x128xf32>
    %41 = vector.shape_cast %40 : vector<1x128xf32> to vector<128xf32>
    %c4 = arith.constant 4 : index
    %c0_20 = arith.constant 0 : index
    %42 = vector.load %arg4[%c4, %c0_20] : memref<8x128xf32, #tpu.memory_space<vmem>>, vector<1x128xf32>
    %43 = vector.shape_cast %42 : vector<1x128xf32> to vector<128xf32>
    %44 = vector.shape_cast %41 : vector<128xf32> to vector<1x128xf32>
    tpu.vector_store %arg4[%c4, %c0_20], %44 {strides = array<i32>} : memref<8x128xf32, #tpu.memory_space<vmem>>, vector<1x128xf32>,
    %cst_21 = arith.constant dense<0.000000e+00> : vector<1x128xf32>
    %45 = tpu.matmul %40, %4, %cst_21 {dimension_numbers = #tpu.dot_dimension_numbers<[1], [0], [0], [1], [0, 0, 1, 1], [], []>} : vector<1x128xf32>, vector<128x128xf32>, vector<1x128xf32> -> vector<1x128xf32>
    %c4_22 = arith.constant 4 : index
    %c0_23 = arith.constant 0 : index
    %46 = vector.load %arg1[%c4_22, %c0_23] : memref<8x128xf32, #tpu.memory_space<vmem>>, vector<1x128xf32>
    %47 = vector.shape_cast %46 : vector<1x128xf32> to vector<128xf32>
    %48 = vector.shape_cast %47 : vector<128xf32> to vector<1x128xf32>
    %49 = arith.addf %45, %48 : vector<1x128xf32>
    %50 = vector.shape_cast %49 : vector<1x128xf32> to vector<128xf32>
    %c5 = arith.constant 5 : index
    %c0_24 = arith.constant 0 : index
    %51 = vector.load %arg4[%c5, %c0_24] : memref<8x128xf32, #tpu.memory_space<vmem>>, vector<1x128xf32>
    %52 = vector.shape_cast %51 : vector<1x128xf32> to vector<128xf32>
    %53 = vector.shape_cast %50 : vector<128xf32> to vector<1x128xf32>
    tpu.vector_store %arg4[%c5, %c0_24], %53 {strides = array<i32>} : memref<8x128xf32, #tpu.memory_space<vmem>>, vector<1x128xf32>,
    %cst_25 = arith.constant dense<0.000000e+00> : vector<1x128xf32>
    %54 = tpu.matmul %49, %4, %cst_25 {dimension_numbers = #tpu.dot_dimension_numbers<[1], [0], [0], [1], [0, 0, 1, 1], [], []>} : vector<1x128xf32>, vector<128x128xf32>, vector<1x128xf32> -> vector<1x128xf32>
    %c5_26 = arith.constant 5 : index
    %c0_27 = arith.constant 0 : index
    %55 = vector.load %arg1[%c5_26, %c0_27] : memref<8x128xf32, #tpu.memory_space<vmem>>, vector<1x128xf32>
    %56 = vector.shape_cast %55 : vector<1x128xf32> to vector<128xf32>
    %57 = vector.shape_cast %56 : vector<128xf32> to vector<1x128xf32>
    %58 = arith.addf %54, %57 : vector<1x128xf32>
    %59 = vector.shape_cast %58 : vector<1x128xf32> to vector<128xf32>
    %c6 = arith.constant 6 : index
    %c0_28 = arith.constant 0 : index
    %60 = vector.load %arg4[%c6, %c0_28] : memref<8x128xf32, #tpu.memory_space<vmem>>, vector<1x128xf32>
    %61 = vector.shape_cast %60 : vector<1x128xf32> to vector<128xf32>
    %62 = vector.shape_cast %59 : vector<128xf32> to vector<1x128xf32>
    tpu.vector_store %arg4[%c6, %c0_28], %62 {strides = array<i32>} : memref<8x128xf32, #tpu.memory_space<vmem>>, vector<1x128xf32>,
    %cst_29 = arith.constant dense<0.000000e+00> : vector<1x128xf32>
    %63 = tpu.matmul %58, %4, %cst_29 {dimension_numbers = #tpu.dot_dimension_numbers<[1], [0], [0], [1], [0, 0, 1, 1], [], []>} : vector<1x128xf32>, vector<128x128xf32>, vector<1x128xf32> -> vector<1x128xf32>
    %c6_30 = arith.constant 6 : index
    %c0_31 = arith.constant 0 : index
    %64 = vector.load %arg1[%c6_30, %c0_31] : memref<8x128xf32, #tpu.memory_space<vmem>>, vector<1x128xf32>
    %65 = vector.shape_cast %64 : vector<1x128xf32> to vector<128xf32>
    %66 = vector.shape_cast %65 : vector<128xf32> to vector<1x128xf32>
    %67 = arith.addf %63, %66 : vector<1x128xf32>
    %68 = vector.shape_cast %67 : vector<1x128xf32> to vector<128xf32>
    %c7 = arith.constant 7 : index
    %c0_32 = arith.constant 0 : index
    %69 = vector.load %arg4[%c7, %c0_32] : memref<8x128xf32, #tpu.memory_space<vmem>>, vector<1x128xf32>
    %70 = vector.shape_cast %69 : vector<1x128xf32> to vector<128xf32>
    %71 = vector.shape_cast %68 : vector<128xf32> to vector<1x128xf32>
    tpu.vector_store %arg4[%c7, %c0_32], %71 {strides = array<i32>} : memref<8x128xf32, #tpu.memory_space<vmem>>, vector<1x128xf32>,
    %cst_33 = arith.constant dense<0.000000e+00> : vector<1x128xf32>
    %72 = tpu.matmul %67, %4, %cst_33 {dimension_numbers = #tpu.dot_dimension_numbers<[1], [0], [0], [1], [0, 0, 1, 1], [], []>} : vector<1x128xf32>, vector<128x128xf32>, vector<1x128xf32> -> vector<1x128xf32>
    %c7_34 = arith.constant 7 : index
    %c0_35 = arith.constant 0 : index
    %73 = vector.load %arg1[%c7_34, %c0_35] : memref<8x128xf32, #tpu.memory_space<vmem>>, vector<1x128xf32>
    %74 = vector.shape_cast %73 : vector<1x128xf32> to vector<128xf32>
    %75 = vector.shape_cast %74 : vector<128xf32> to vector<1x128xf32>
    %76 = arith.addf %72, %75 : vector<1x128xf32>
    %c0_36 = arith.constant 0 : index
    %c0_37 = arith.constant 0 : index
    %77 = vector.load %arg5[%c0_36, %c0_37] : memref<1x128xf32, #tpu.memory_space<vmem>>, vector<1x128xf32>
    tpu.vector_store %arg5[%c0_36, %c0_37], %76 {strides = array<i32>} : memref<1x128xf32, #tpu.memory_space<vmem>>, vector<1x128xf32>,
    return
  }
  func.func @transform_0(%arg0: i32) -> (i32, i32) {
    %c0_i32 = arith.constant 0 : i32
    %c0_i32_0 = arith.constant 0 : i32
    return %arg0, %c0_i32 : i32, i32
  }
  func.func @transform_1(%arg0: i32) -> (i32, i32) {
    %c0_i32 = arith.constant 0 : i32
    %c0_i32_0 = arith.constant 0 : i32
    %c0_i32_1 = arith.constant 0 : i32
    return %c0_i32, %c0_i32_0 : i32, i32
  }
  func.func @transform_2(%arg0: i32) -> (i32, i32) {
    %c0_i32 = arith.constant 0 : i32
    %c0_i32_0 = arith.constant 0 : i32
    %c0_i32_1 = arith.constant 0 : i32
    return %c0_i32, %c0_i32_0 : i32, i32
  }
  func.func @transform_3(%arg0: i32) -> (i32, i32) {
    %c0_i32 = arith.constant 0 : i32
    %c0_i32_0 = arith.constant 0 : i32
    return %arg0, %c0_i32 : i32, i32
  }
}

module attributes {stable_mosaic.version = 11 : i64} {
  func.func @rnn_output_kernel(%arg0: i32, %arg1: memref<8x128xf32, #tpu.memory_space<vmem>>, %arg2: memref<8x128xf32, #tpu.memory_space<vmem>>, %arg3: memref<128x128xf32, #tpu.memory_space<vmem>>, %arg4: memref<8x128xf32, #tpu.memory_space<vmem>>) attributes {dimension_semantics = [#tpu.dimension_semantics<parallel>], iteration_bounds = array<i64: 1>, scalar_prefetch = 0 : i64, scratch_operands = 0 : i64, tpu.core_type = #tpu.core_type<tc>, window_params = [{transform_indices = @transform_0, window_bounds = array<i64: 8, 128>}, {transform_indices = @transform_1, window_bounds = array<i64: 8, 128>}, {pipeline_mode = #tpu.pipeline_mode<synchronous>, transform_indices = @transform_2, window_bounds = array<i64: 128, 128>}, {transform_indices = @transform_3, window_bounds = array<i64: 8, 128>}]} {
    %c0 = arith.constant 0 : index
    %c0_0 = arith.constant 0 : index
    %0 = vector.load %arg1[%c0, %c0_0] : memref<8x128xf32, #tpu.memory_space<vmem>>, vector<8x128xf32>
    %c0_1 = arith.constant 0 : index
    %c0_2 = arith.constant 0 : index
    %1 = vector.load %arg3[%c0_1, %c0_2] : memref<128x128xf32, #tpu.memory_space<vmem>>, vector<128x128xf32>
    %cst = arith.constant dense<0.000000e+00> : vector<8x128xf32>
    %2 = tpu.matmul %0, %1, %cst {dimension_numbers = #tpu.dot_dimension_numbers<[1], [0], [0], [1], [0, 0, 1, 1], [], []>} : vector<8x128xf32>, vector<128x128xf32>, vector<8x128xf32> -> vector<8x128xf32>
    %c0_3 = arith.constant 0 : index
    %c0_4 = arith.constant 0 : index
    %3 = vector.load %arg2[%c0_3, %c0_4] : memref<8x128xf32, #tpu.memory_space<vmem>>, vector<8x128xf32>
    %4 = arith.addf %2, %3 : vector<8x128xf32>
    %5 = tpu.iota {dimensions = array<i32: 1>} : vector<8x128xi32>
    %c18_i32 = arith.constant 18 : i32
    %6 = vector.broadcast %c18_i32 : i32 to vector<8x128xi32>
    %7 = arith.cmpi slt, %5, %6 : vector<8x128xi32>
    %cst_5 = arith.constant -1.000000e+30 : f32
    %8 = vector.broadcast %cst_5 : f32 to vector<8x128xf32>
    %9 = arith.select %7, %4, %8 : vector<8x128xi1>, vector<8x128xf32>
    %cst_6 = arith.constant dense<0xFF800000> : vector<8xf32>
    %10 = vector.multi_reduction <maximumf>, %9, %cst_6 [1] : vector<8x128xf32> to vector<8xf32>
    %11 = vector.shape_cast %10 : vector<8xf32> to vector<8x1xf32>
    %12 = vector.broadcast %11 : vector<8x1xf32> to vector<8x128xf32>
    %13 = arith.subf %9, %12 : vector<8x128xf32>
    %14 = math.exp %13 : vector<8x128xf32>
    %cst_7 = arith.constant dense<0.000000e+00> : vector<8xf32>
    %15 = vector.multi_reduction <add>, %14, %cst_7 [1] : vector<8x128xf32> to vector<8xf32>
    %16 = vector.shape_cast %15 : vector<8xf32> to vector<8x1xf32>
    %17 = math.log %16 : vector<8x1xf32>
    %18 = vector.broadcast %17 : vector<8x1xf32> to vector<8x128xf32>
    %19 = arith.subf %13, %18 : vector<8x128xf32>
    %c0_8 = arith.constant 0 : index
    %c0_9 = arith.constant 0 : index
    %20 = vector.load %arg4[%c0_8, %c0_9] : memref<8x128xf32, #tpu.memory_space<vmem>>, vector<8x128xf32>
    tpu.vector_store %arg4[%c0_8, %c0_9], %19 {strides = array<i32>} : memref<8x128xf32, #tpu.memory_space<vmem>>, vector<8x128xf32>,
    return
  }
  func.func @transform_0(%arg0: i32) -> (i32, i32) {
    %c0_i32 = arith.constant 0 : i32
    %c0_i32_0 = arith.constant 0 : i32
    return %arg0, %c0_i32 : i32, i32
  }
  func.func @transform_1(%arg0: i32) -> (i32, i32) {
    %c0_i32 = arith.constant 0 : i32
    %c0_i32_0 = arith.constant 0 : i32
    return %arg0, %c0_i32 : i32, i32
  }
  func.func @transform_2(%arg0: i32) -> (i32, i32) {
    %c0_i32 = arith.constant 0 : i32
    %c0_i32_0 = arith.constant 0 : i32
    %c0_i32_1 = arith.constant 0 : i32
    return %c0_i32, %c0_i32_0 : i32, i32
  }
  func.func @transform_3(%arg0: i32) -> (i32, i32) {
    %c0_i32 = arith.constant 0 : i32
    %c0_i32_0 = arith.constant 0 : i32
    return %arg0, %c0_i32 : i32, i32
  }
}

</mosaic_0001>

<bundles_post_ra>
// kernel: rnn_sequence.3
= control target key start
LH: loop header
LB: loop body
LE: loop exit
PB: predicated region body
PF: predicated region fallthrough
CT: control target
= control target key end

     0   :  { %v179_v0 = vmov 0.0   ;;  %vm180_vm0 = vmmov 0   ;;  %v102_v18 = vlaneseq  ;;  %s258_s2 = inlined_call_operand.vmem [shape: f32[128,128], index: 2, kind: input, shape index: {}]   ;;  %s259_s0 = inlined_call_operand.vmem [shape: f32[8,128], index: 0, kind: input, shape index: {}]   ;;  %s260_s1 = inlined_call_operand.vmem [shape: f32[8,128], index: 1, kind: input, shape index: {}]   ;;  %s261_s3 = inlined_call_operand.vmem [shape: f32[8,128], index: 3, kind: output, shape index: {}]  }
   0x1   :  { %138 = vmatprep.subr.mxu0 %v179_v0  ;;  %v30_v1 = vld [vmem:[%s258_s2 + $0x78] sm:$0xff]  ;;  %v29_v2 = vld [vmem:[%s258_s2 + $0x70] sm:$0xff]  ;;  %170 = vmatprep.mubr.msk.f32.mxu0 %vm180_vm0, %v179_v0  ;;  %v28_v3 = vld [vmem:[%s258_s2 + $0x68] sm:$0xff] }
   0x2   :  { %139 = vmatpush3.msra.mxu0 %v30_v1  ;;  %v27_v4 = vld [vmem:[%s258_s2 + $0x60] sm:$0xff]  ;;  %v26_v5 = vld [vmem:[%s258_s2 + $0x58] sm:$0xff]  ;;  %v25_v6 = vld [vmem:[%s258_s2 + $0x50] sm:$0xff]  ;;  %v103_v19 = vand.u32 127, %v102_v18 }
   0x3   :  { %140 = vmatprep.subr.mxu0 %v179_v0  ;;  %v24_v7 = vld [vmem:[%s258_s2 + $0x48] sm:$0xff]  ;;  %v23_v8 = vld [vmem:[%s258_s2 + $0x40] sm:$0xff]  ;;  %v22_v9 = vld [vmem:[%s258_s2 + $0x38] sm:$0xff] }
   0x4   :  { %141 = vmatpush3.msra.mxu0 %v29_v2  ;;  %v21_v10 = vld [vmem:[%s258_s2 + $0x30] sm:$0xff]  ;;  %v20_v11 = vld [vmem:[%s258_s2 + $0x28] sm:$0xff]  ;;  %v19_v12 = vld [vmem:[%s258_s2 + $0x20] sm:$0xff]  ;;  %vm104_vm1 = vcmp.lt.s32.totalorder %v103_v19, 18 }
   0x5   :  { %142 = vmatprep.subr.mxu0 %v179_v0  ;;  %v18_v13 = vld [vmem:[%s258_s2 + $0x18] sm:$0xff]  ;;  %v17_v14 = vld [vmem:[%s258_s2 + $0x10] sm:$0xff]  ;;  %v16_v15 = vld [vmem:[%s258_s2 + $0x8] sm:$0xff] }
   0x6   :  { %143 = vmatpush3.msra.mxu0 %v28_v3  ;;  %v15_v16 = vld [vmem:[%s258_s2] sm:$0xff] }
   0x7   :  { %144 = vmatprep.subr.mxu0 %v179_v0  ;;  %v14_v17 = vld [vmem:[%s259_s0] sm:$0xff] }
   0x8   :  { %145 = vmatpush3.msra.mxu0 %v27_v4  ;;  %v31_v20 = vld [vmem:[%s260_s1] sm:$0xff] }
   0x9   :  { %146 = vmatprep.subr.mxu0 %v179_v0 }
   0xa   :  { %147 = vmatpush3.msra.mxu0 %v26_v5 }
   0xb   :  { %148 = vmatprep.subr.mxu0 %v179_v0 }
   0xc   :  { %149 = vmatpush3.msra.mxu0 %v25_v6 }
   0xd   :  { %150 = vmatprep.subr.mxu0 %v179_v0 }
   0xe   :  { %151 = vmatpush3.msra.mxu0 %v24_v7 }
   0xf   :  { %152 = vmatprep.subr.mxu0 %v179_v0 }
  0x10   :  { %153 = vmatpush3.msra.mxu0 %v23_v8 }
  0x11   :  { %154 = vmatprep.subr.mxu0 %v179_v0 }
  0x12   :  { %155 = vmatpush3.msra.mxu0 %v22_v9 }
  0x13   :  { %156 = vmatprep.subr.mxu0 %v179_v0 }
  0x14   :  { %157 = vmatpush3.msra.mxu0 %v21_v10 }
  0x15   :  { %158 = vmatprep.subr.mxu0 %v179_v0 }
  0x16   :  { %159 = vmatpush3.msra.mxu0 %v20_v11 }
  0x17   :  { %160 = vmatprep.subr.mxu0 %v179_v0 }
  0x18   :  { %161 = vmatpush3.msra.mxu0 %v19_v12 }
  0x19   :  { %162 = vmatprep.subr.mxu0 %v179_v0 }
  0x1a   :  { %163 = vmatpush3.msra.mxu0 %v18_v13 }
  0x1b   :  { %164 = vmatprep.subr.mxu0 %v179_v0 }
  0x1c   :  { %165 = vmatpush3.msra.mxu0 %v17_v14 }
  0x1d   :  { %166 = vmatprep.subr.mxu0 %v179_v0 }
  0x1e   :  { %167 = vmatpush3.msra.mxu0 %v16_v15 }
  0x1f   :  { %168 = vmatprep.subr.mxu0 %v179_v0 }
  0x20   :  { %169 = vmatpush3.msra.mxu0 %v15_v16 }
  0x21   :  { %171 = vmatmul.mubr.f32.vlgmr.msra.gmra.mxu0 %v14_v17 }
  0xe1   :  { %v98_v21 = vpop.f32.mrf.mxu0 }
  0xe2   :  { %v99_v22 = vadd.f32 %v98_v21, %v31_v20 }
  0xe3   :  { %v172_v23 = vpop.f32.mrf.mxu0 }
  0xe4   :  { %v105_v24 = vsel %vm104_vm1, %v99_v22, -1e+30 }
  0xe5   :  { %106 = vmax.xlane.f32.xlu0 %v105_v24 }
 0x16e   :  { %v107_v25 = vpop.xlane.xlu0 %106 }
 0x16f   :  { %v108_v26 = vsub.f32 %v105_v24, %v107_v25 }
 0x171   :  { %v109_v27 = vmul.f32 1.442695, %v108_v26 }
 0x173   :  { %175 = vpow2.f32 %v109_v27 }
 0x180   :  { %v176_v28 = vpop.eup %175 }
 0x181   :  { %111 = vadd.xlane.f32.xlu0 %v176_v28 }
 0x20a   :  { %v112_v29 = vpop.xlane.xlu0 %111 }
 0x20b   :  { %177 = vlog2.f32 %v112_v29 }
 0x218   :  { %v178_v30 = vpop.eup %177 }
 0x219   :  { %v114_v31 = vmul.f32 0.6931472, %v178_v30 }
 0x21b   :  { %v115_v32 = vsub.f32 %v108_v26, %v114_v31 }
 0x21d   :  { %116 = vst [vmem:[%s261_s3] sm:$0xff] %v115_v32 }

// kernel: rnn_sequence.2
= control target key start
LH: loop header
LB: loop body
LE: loop exit
PB: predicated region body
PF: predicated region fallthrough
CT: control target
= control target key end

     0   :  { %v1036_v0 = vmov 0.0   ;;  %vm1037_vm0 = vmmov 0   ;;  %s1461_s1 = inlined_call_operand.vmem [shape: f32[128,128], index: 1, kind: input, shape index: {}]   ;;  %s1462_s2 = inlined_call_operand.vmem [shape: f32[1,128], index: 2, kind: input, shape index: {}]   ;;  %s1463_s3 = inlined_call_operand.vmem [shape: f32[8,128], index: 3, kind: output, shape index: {}]   ;;  %s1464_s0 = inlined_call_operand.vmem [shape: f32[8,128], index: 0, kind: input, shape index: {}]  }
   0x1   :  { %754 = vmatprep.subr.mxu0 %v1036_v0  ;;  %v1062_v1 = vld [vmem:[%s1461_s1 + $0x78] sm:$0xff]  ;;  %v1067_v2 = vld [vmem:[%s1461_s1 + $0x70] sm:$0xff]  ;;  %786 = vmatprep.mubr.msk.f32.mxu0 %vm1037_vm0, %v1036_v0  ;;  %v1077_v3 = vld [vmem:[%s1461_s1 + $0x68] sm:$0xff] }
   0x2   :  { %755 = vmatpush3.msra.mxu0 %v1062_v1  ;;  %789 = vmatprep.subr.mxu1 %v1036_v0  ;;  %v1086_v4 = vld [vmem:[%s1461_s1 + $0x60] sm:$0xff]  ;;  %v1098_v6 = vld [vmem:[%s1461_s1 + $0x58] sm:$0xff]  ;;  %v1107_v7 = vld [vmem:[%s1461_s1 + $0x50] sm:$0xff] }
   0x3   :  { %756 = vmatprep.subr.mxu0 %v1036_v0  ;;  %790 = vmatpush3.msra.mxu1 %v1062_v1  ;;  %v18_v5 = vld [vmem:[%s1462_s2] sm:$0x1]  ;;  %v1116_v8 = vld [vmem:[%s1461_s1 + $0x48] sm:$0xff]  ;;  %v1134_v11 = vld [vmem:[%s1461_s1 + $0x38] sm:$0xff] }
   0x4   :  { %757 = vmatpush3.msra.mxu0 %v1067_v2  ;;  %791 = vmatprep.subr.mxu1 %v1036_v0  ;;  %19 = vst [vmem:[#allocation2] sm:$0x1] %v18_v5  ;;  %v1125_v9 = vld [vmem:[%s1461_s1 + $0x40] sm:$0xff]  ;;  %v1146_v12 = vld [vmem:[%s1461_s1 + $0x30] sm:$0xff]  ;;  %v1155_v13 = vld [vmem:[%s1461_s1 + $0x28] sm:$0xff] }
   0x5   :  { %758 = vmatprep.subr.mxu0 %v1036_v0  ;;  %792 = vmatpush3.msra.mxu1 %v1067_v2  ;;  %v1164_v14 = vld [vmem:[%s1461_s1 + $0x20] sm:$0xff]  ;;  %v1173_v15 = vld [vmem:[%s1461_s1 + $0x18] sm:$0xff]  ;;  %v1182_v16 = vld [vmem:[%s1461_s1 + $0x10] sm:$0xff] }
   0x6   :  { %759 = vmatpush3.msra.mxu0 %v1077_v3  ;;  %793 = vmatprep.subr.mxu1 %v1036_v0  ;;  %v1191_v17 = vld [vmem:[%s1461_s1 + $0x8] sm:$0xff]  ;;  %v1200_v18 = vld [vmem:[%s1461_s1] sm:$0xff] }
   0x7   :  { %760 = vmatprep.subr.mxu0 %v1036_v0  ;;  %794 = vmatpush3.msra.mxu1 %v1077_v3  ;;  %v38_v19 = vld [vmem:[%s1464_s0] sm:$0x1]  ;;  %v110_v23 = vld [vmem:[%s1464_s0 + $0x1] sm:$0x1]  ;;  %v182_v27 = vld [vmem:[%s1464_s0 + $0x2] sm:$0x1] }
   0x8   :  { %761 = vmatpush3.msra.mxu0 %v1086_v4  ;;  %795 = vmatprep.subr.mxu1 %v1036_v0  ;;  %v254_v31 = vld [vmem:[%s1464_s0 + $0x3] sm:$0x1]  ;;  %v326_v35 = vld [vmem:[%s1464_s0 + $0x4] sm:$0x1]  ;;  %v398_v39 = vld [vmem:[%s1464_s0 + $0x5] sm:$0x1] }
   0x9   :  { %762 = vmatprep.subr.mxu0 %v1036_v0  ;;  %796 = vmatpush3.msra.mxu1 %v1086_v4  ;;  %v470_v43 = vld [vmem:[%s1464_s0 + $0x6] sm:$0x1]  ;;  %v542_v47 = vld [vmem:[%s1464_s0 + $0x7] sm:$0x1] }
   0xa   :  { %763 = vmatpush3.msra.mxu0 %v1098_v6  ;;  %797 = vmatprep.subr.mxu1 %v1036_v0 }
   0xb   :  { %764 = vmatprep.subr.mxu0 %v1036_v0  ;;  %798 = vmatpush3.msra.mxu1 %v1098_v6  ;;  %v20_v10 = vld [vmem:[#allocation2] sm:$0x1] }
   0xc   :  { %765 = vmatpush3.msra.mxu0 %v1107_v7  ;;  %799 = vmatprep.subr.mxu1 %v1036_v0  ;;  %37 = vst [vmem:[%s1463_s3] sm:$0x1] %v20_v10 }
   0xd   :  { %766 = vmatprep.subr.mxu0 %v1036_v0  ;;  %800 = vmatpush3.msra.mxu1 %v1107_v7 }
   0xe   :  { %767 = vmatpush3.msra.mxu0 %v1116_v8  ;;  %801 = vmatprep.subr.mxu1 %v1036_v0 }
   0xf   :  { %768 = vmatprep.subr.mxu0 %v1036_v0  ;;  %802 = vmatpush3.msra.mxu1 %v1116_v8 }
  0x10   :  { %769 = vmatpush3.msra.mxu0 %v1125_v9  ;;  %803 = vmatprep.subr.mxu1 %v1036_v0 }
  0x11   :  { %770 = vmatprep.subr.mxu0 %v1036_v0  ;;  %804 = vmatpush3.msra.mxu1 %v1125_v9 }
  0x12   :  { %771 = vmatpush3.msra.mxu0 %v1134_v11  ;;  %805 = vmatprep.subr.mxu1 %v1036_v0 }
  0x13   :  { %772 = vmatprep.subr.mxu0 %v1036_v0  ;;  %806 = vmatpush3.msra.mxu1 %v1134_v11 }
  0x14   :  { %773 = vmatpush3.msra.mxu0 %v1146_v12  ;;  %807 = vmatprep.subr.mxu1 %v1036_v0 }
  0x15   :  { %774 = vmatprep.subr.mxu0 %v1036_v0  ;;  %808 = vmatpush3.msra.mxu1 %v1146_v12 }
  0x16   :  { %775 = vmatpush3.msra.mxu0 %v1155_v13  ;;  %809 = vmatprep.subr.mxu1 %v1036_v0 }
  0x17   :  { %776 = vmatprep.subr.mxu0 %v1036_v0  ;;  %810 = vmatpush3.msra.mxu1 %v1155_v13 }
  0x18   :  { %777 = vmatpush3.msra.mxu0 %v1164_v14  ;;  %811 = vmatprep.subr.mxu1 %v1036_v0 }
  0x19   :  { %778 = vmatprep.subr.mxu0 %v1036_v0  ;;  %812 = vmatpush3.msra.mxu1 %v1164_v14 }
  0x1a   :  { %779 = vmatpush3.msra.mxu0 %v1173_v15  ;;  %813 = vmatprep.subr.mxu1 %v1036_v0 }
  0x1b   :  { %780 = vmatprep.subr.mxu0 %v1036_v0  ;;  %814 = vmatpush3.msra.mxu1 %v1173_v15 }
  0x1c   :  { %781 = vmatpush3.msra.mxu0 %v1182_v16  ;;  %815 = vmatprep.subr.mxu1 %v1036_v0 }
  0x1d   :  { %782 = vmatprep.subr.mxu0 %v1036_v0  ;;  %816 = vmatpush3.msra.mxu1 %v1182_v16 }
  0x1e   :  { %783 = vmatpush3.msra.mxu0 %v1191_v17  ;;  %817 = vmatprep.subr.mxu1 %v1036_v0 }
  0x1f   :  { %784 = vmatprep.subr.mxu0 %v1036_v0  ;;  %818 = vmatpush3.msra.mxu1 %v1191_v17 }
  0x20   :  { %785 = vmatpush3.msra.mxu0 %v1200_v18  ;;  %819 = vmatprep.subr.mxu1 %v1036_v0 }
  0x21   :  { %787 = vmatmul.mubr.f32.vlgmr.msra.gmra.mxu0 %v20_v10  ;;  %820 = vmatpush3.msra.mxu1 %v1200_v18 }
  0x22   :  { %821 = vmatprep.mubr.msk.f32.mxu1 %vm1037_vm0, %v1036_v0  ;;  %824 = vmatprep.subr.mxu0 %v1036_v0 }
  0x23   :  { %825 = vmatpush3.msra.mxu0 %v1062_v1  ;;  %856 = vmatprep.mubr.msk.f32.mxu0 %vm1037_vm0, %v1036_v0 }
  0x24   :  { %826 = vmatprep.subr.mxu0 %v1036_v0  ;;  %859 = vmatprep.subr.mxu1 %v1036_v0 }
  0x25   :  { %827 = vmatpush3.msra.mxu0 %v1067_v2 }
  0x26   :  { %828 = vmatprep.subr.mxu0 %v1036_v0 }
  0x27   :  { %829 = vmatpush3.msra.mxu0 %v1077_v3 }
  0x28   :  { %830 = vmatprep.subr.mxu0 %v1036_v0 }
  0x29   :  { %831 = vmatpush3.msra.mxu0 %v1086_v4 }
  0x2a   :  { %832 = vmatprep.subr.mxu0 %v1036_v0 }
  0x2b   :  { %833 = vmatpush3.msra.mxu0 %v1098_v6 }
  0x2c   :  { %834 = vmatprep.subr.mxu0 %v1036_v0 }
  0x2d   :  { %835 = vmatpush3.msra.mxu0 %v1107_v7 }
  0x2e   :  { %836 = vmatprep.subr.mxu0 %v1036_v0 }
  0x2f   :  { %837 = vmatpush3.msra.mxu0 %v1116_v8 }
  0x30   :  { %838 = vmatprep.subr.mxu0 %v1036_v0 }
  0x31   :  { %839 = vmatpush3.msra.mxu0 %v1125_v9 }
  0x32   :  { %840 = vmatprep.subr.mxu0 %v1036_v0 }
  0x33   :  { %841 = vmatpush3.msra.mxu0 %v1134_v11 }
  0x34   :  { %842 = vmatprep.subr.mxu0 %v1036_v0 }
  0x35   :  { %843 = vmatpush3.msra.mxu0 %v1146_v12 }
  0x36   :  { %844 = vmatprep.subr.mxu0 %v1036_v0 }
  0x37   :  { %845 = vmatpush3.msra.mxu0 %v1155_v13 }
  0x38   :  { %846 = vmatprep.subr.mxu0 %v1036_v0 }
  0x39   :  { %847 = vmatpush3.msra.mxu0 %v1164_v14 }
  0x3a   :  { %848 = vmatprep.subr.mxu0 %v1036_v0 }
  0x3b   :  { %849 = vmatpush3.msra.mxu0 %v1173_v15 }
  0x3c   :  { %850 = vmatprep.subr.mxu0 %v1036_v0 }
  0x3d   :  { %851 = vmatpush3.msra.mxu0 %v1182_v16 }
  0x3e   :  { %852 = vmatprep.subr.mxu0 %v1036_v0 }
  0x3f   :  { %853 = vmatpush3.msra.mxu0 %v1191_v17 }
  0x40   :  { %854 = vmatprep.subr.mxu0 %v1036_v0 }
  0x41   :  { %855 = vmatpush3.msra.mxu0 %v1200_v18 }
  0x42   :  { %894 = vmatprep.subr.mxu0 %v1036_v0 }
  0xe1   :  { %v105_v20 = vpop.f32.mrf.mxu0 }
  0xe2   :  { %v106_v21 = vadd.f32 %v105_v20, %v38_v19 }
  0xe3   :  { %v788_v22 = vpop.f32.mrf.mxu0 }
  0xe4   :  { %109 = vst [vmem:[%s1463_s3 + $0x1] sm:$0x1] %v106_v21  ;;  %822 = vmatmul.mubr.f32.vlgmr.msra.gmra.mxu1 %v106_v21 }
  0xe5   :  { %860 = vmatpush3.msra.mxu1 %v1062_v1  ;;  %891 = vmatprep.mubr.msk.f32.mxu1 %vm1037_vm0, %v1036_v0 }
  0xe6   :  { %861 = vmatprep.subr.mxu1 %v1036_v0 }
  0xe7   :  { %862 = vmatpush3.msra.mxu1 %v1067_v2 }
  0xe8   :  { %863 = vmatprep.subr.mxu1 %v1036_v0 }
  0xe9   :  { %864 = vmatpush3.msra.mxu1 %v1077_v3 }
  0xea   :  { %865 = vmatprep.subr.mxu1 %v1036_v0 }
  0xeb   :  { %866 = vmatpush3.msra.mxu1 %v1086_v4 }
  0xec   :  { %867 = vmatprep.subr.mxu1 %v1036_v0 }
  0xed   :  { %868 = vmatpush3.msra.mxu1 %v1098_v6 }
  0xee   :  { %869 = vmatprep.subr.mxu1 %v1036_v0 }
  0xef   :  { %870 = vmatpush3.msra.mxu1 %v1107_v7 }
  0xf0   :  { %871 = vmatprep.subr.mxu1 %v1036_v0 }
  0xf1   :  { %872 = vmatpush3.msra.mxu1 %v1116_v8 }
  0xf2   :  { %873 = vmatprep.subr.mxu1 %v1036_v0 }
  0xf3   :  { %874 = vmatpush3.msra.mxu1 %v1125_v9 }
  0xf4   :  { %875 = vmatprep.subr.mxu1 %v1036_v0 }
  0xf5   :  { %876 = vmatpush3.msra.mxu1 %v1134_v11 }
  0xf6   :  { %877 = vmatprep.subr.mxu1 %v1036_v0 }
  0xf7   :  { %878 = vmatpush3.msra.mxu1 %v1146_v12 }
  0xf8   :  { %879 = vmatprep.subr.mxu1 %v1036_v0 }
  0xf9   :  { %880 = vmatpush3.msra.mxu1 %v1155_v13 }
  0xfa   :  { %881 = vmatprep.subr.mxu1 %v1036_v0 }
  0xfb   :  { %882 = vmatpush3.msra.mxu1 %v1164_v14 }
  0xfc   :  { %883 = vmatprep.subr.mxu1 %v1036_v0 }
  0xfd   :  { %884 = vmatpush3.msra.mxu1 %v1173_v15 }
  0xfe   :  { %885 = vmatprep.subr.mxu1 %v1036_v0 }
  0xff   :  { %886 = vmatpush3.msra.mxu1 %v1182_v16 }
 0x100   :  { %887 = vmatprep.subr.mxu1 %v1036_v0 }
 0x101   :  { %888 = vmatpush3.msra.mxu1 %v1191_v17 }
 0x102   :  { %889 = vmatprep.subr.mxu1 %v1036_v0 }
 0x103   :  { %890 = vmatpush3.msra.mxu1 %v1200_v18 }
 0x104   :  { %929 = vmatprep.subr.mxu1 %v1036_v0 }
 0x1a4   :  { %v177_v24 = vpop.f32.mrf.mxu1 }
 0x1a5   :  { %v178_v25 = vadd.f32 %v177_v24, %v110_v23 }
 0x1a6   :  { %v823_v26 = vpop.f32.mrf.mxu1 }
 0x1a7   :  { %181 = vst [vmem:[%s1463_s3 + $0x2] sm:$0x1] %v178_v25  ;;  %857 = vmatmul.mubr.f32.vlgmr.msra.gmra.mxu0 %v178_v25 }
 0x1a8   :  { %895 = vmatpush3.msra.mxu0 %v1062_v1  ;;  %926 = vmatprep.mubr.msk.f32.mxu0 %vm1037_vm0, %v1036_v0 }
 0x1a9   :  { %896 = vmatprep.subr.mxu0 %v1036_v0 }
 0x1aa   :  { %897 = vmatpush3.msra.mxu0 %v1067_v2 }
 0x1ab   :  { %898 = vmatprep.subr.mxu0 %v1036_v0 }
 0x1ac   :  { %899 = vmatpush3.msra.mxu0 %v1077_v3 }
 0x1ad   :  { %900 = vmatprep.subr.mxu0 %v1036_v0 }
 0x1ae   :  { %901 = vmatpush3.msra.mxu0 %v1086_v4 }
 0x1af   :  { %902 = vmatprep.subr.mxu0 %v1036_v0 }
 0x1b0   :  { %903 = vmatpush3.msra.mxu0 %v1098_v6 }
 0x1b1   :  { %904 = vmatprep.subr.mxu0 %v1036_v0 }
 0x1b2   :  { %905 = vmatpush3.msra.mxu0 %v1107_v7 }
 0x1b3   :  { %906 = vmatprep.subr.mxu0 %v1036_v0 }
 0x1b4   :  { %907 = vmatpush3.msra.mxu0 %v1116_v8 }
 0x1b5   :  { %908 = vmatprep.subr.mxu0 %v1036_v0 }
 0x1b6   :  { %909 = vmatpush3.msra.mxu0 %v1125_v9 }
 0x1b7   :  { %910 = vmatprep.subr.mxu0 %v1036_v0 }
 0x1b8   :  { %911 = vmatpush3.msra.mxu0 %v1134_v11 }
 0x1b9   :  { %912 = vmatprep.subr.mxu0 %v1036_v0 }
 0x1ba   :  { %913 = vmatpush3.msra.mxu0 %v1146_v12 }
 0x1bb   :  { %914 = vmatprep.subr.mxu0 %v1036_v0 }
 0x1bc   :  { %915 = vmatpush3.msra.mxu0 %v1155_v13 }
 0x1bd   :  { %916 = vmatprep.subr.mxu0 %v1036_v0 }
 0x1be   :  { %917 = vmatpush3.msra.mxu0 %v1164_v14 }
 0x1bf   :  { %918 = vmatprep.subr.mxu0 %v1036_v0 }
 0x1c0   :  { %919 = vmatpush3.msra.mxu0 %v1173_v15 }
 0x1c1   :  { %920 = vmatprep.subr.mxu0 %v1036_v0 }
 0x1c2   :  { %921 = vmatpush3.msra.mxu0 %v1182_v16 }
 0x1c3   :  { %922 = vmatprep.subr.mxu0 %v1036_v0 }
 0x1c4   :  { %923 = vmatpush3.msra.mxu0 %v1191_v17 }
 0x1c5   :  { %924 = vmatprep.subr.mxu0 %v1036_v0 }
 0x1c6   :  { %925 = vmatpush3.msra.mxu0 %v1200_v18 }
 0x1c7   :  { %964 = vmatprep.subr.mxu0 %v1036_v0 }
 0x267   :  { %v249_v28 = vpop.f32.mrf.mxu0 }
 0x268   :  { %v250_v29 = vadd.f32 %v249_v28, %v182_v27 }
 0x269   :  { %v858_v30 = vpop.f32.mrf.mxu0 }
 0x26a   :  { %253 = vst [vmem:[%s1463_s3 + $0x3] sm:$0x1] %v250_v29  ;;  %892 = vmatmul.mubr.f32.vlgmr.msra.gmra.mxu1 %v250_v29 }
 0x26b   :  { %930 = vmatpush3.msra.mxu1 %v1062_v1  ;;  %961 = vmatprep.mubr.msk.f32.mxu1 %vm1037_vm0, %v1036_v0 }
 0x26c   :  { %931 = vmatprep.subr.mxu1 %v1036_v0 }
 0x26d   :  { %932 = vmatpush3.msra.mxu1 %v1067_v2 }
 0x26e   :  { %933 = vmatprep.subr.mxu1 %v1036_v0 }
 0x26f   :  { %934 = vmatpush3.msra.mxu1 %v1077_v3 }
 0x270   :  { %935 = vmatprep.subr.mxu1 %v1036_v0 }
 0x271   :  { %936 = vmatpush3.msra.mxu1 %v1086_v4 }
 0x272   :  { %937 = vmatprep.subr.mxu1 %v1036_v0 }
 0x273   :  { %938 = vmatpush3.msra.mxu1 %v1098_v6 }
 0x274   :  { %939 = vmatprep.subr.mxu1 %v1036_v0 }
 0x275   :  { %940 = vmatpush3.msra.mxu1 %v1107_v7 }
 0x276   :  { %941 = vmatprep.subr.mxu1 %v1036_v0 }
 0x277   :  { %942 = vmatpush3.msra.mxu1 %v1116_v8 }
 0x278   :  { %943 = vmatprep.subr.mxu1 %v1036_v0 }
 0x279   :  { %944 = vmatpush3.msra.mxu1 %v1125_v9 }
 0x27a   :  { %945 = vmatprep.subr.mxu1 %v1036_v0 }
 0x27b   :  { %946 = vmatpush3.msra.mxu1 %v1134_v11 }
 0x27c   :  { %947 = vmatprep.subr.mxu1 %v1036_v0 }
 0x27d   :  { %948 = vmatpush3.msra.mxu1 %v1146_v12 }
 0x27e   :  { %949 = vmatprep.subr.mxu1 %v1036_v0 }
 0x27f   :  { %950 = vmatpush3.msra.mxu1 %v1155_v13 }
 0x280   :  { %951 = vmatprep.subr.mxu1 %v1036_v0 }
 0x281   :  { %952 = vmatpush3.msra.mxu1 %v1164_v14 }
 0x282   :  { %953 = vmatprep.subr.mxu1 %v1036_v0 }
 0x283   :  { %954 = vmatpush3.msra.mxu1 %v1173_v15 }
 0x284   :  { %955 = vmatprep.subr.mxu1 %v1036_v0 }
 0x285   :  { %956 = vmatpush3.msra.mxu1 %v1182_v16 }
 0x286   :  { %957 = vmatprep.subr.mxu1 %v1036_v0 }
 0x287   :  { %958 = vmatpush3.msra.mxu1 %v1191_v17 }
 0x288   :  { %959 = vmatprep.subr.mxu1 %v1036_v0 }
 0x289   :  { %960 = vmatpush3.msra.mxu1 %v1200_v18 }
 0x28a   :  { %999 = vmatprep.subr.mxu1 %v1036_v0 }
 0x32a   :  { %v321_v32 = vpop.f32.mrf.mxu1 }
 0x32b   :  { %v322_v33 = vadd.f32 %v321_v32, %v254_v31 }
 0x32c   :  { %v893_v34 = vpop.f32.mrf.mxu1 }
 0x32d   :  { %325 = vst [vmem:[%s1463_s3 + $0x4] sm:$0x1] %v322_v33  ;;  %927 = vmatmul.mubr.f32.vlgmr.msra.gmra.mxu0 %v322_v33 }
 0x32e   :  { %965 = vmatpush3.msra.mxu0 %v1062_v1  ;;  %996 = vmatprep.mubr.msk.f32.mxu0 %vm1037_vm0, %v1036_v0 }
 0x32f   :  { %966 = vmatprep.subr.mxu0 %v1036_v0 }
 0x330   :  { %967 = vmatpush3.msra.mxu0 %v1067_v2 }
 0x331   :  { %968 = vmatprep.subr.mxu0 %v1036_v0 }
 0x332   :  { %969 = vmatpush3.msra.mxu0 %v1077_v3 }
 0x333   :  { %970 = vmatprep.subr.mxu0 %v1036_v0 }
 0x334   :  { %971 = vmatpush3.msra.mxu0 %v1086_v4 }
 0x335   :  { %972 = vmatprep.subr.mxu0 %v1036_v0 }
 0x336   :  { %973 = vmatpush3.msra.mxu0 %v1098_v6 }
 0x337   :  { %974 = vmatprep.subr.mxu0 %v1036_v0 }
 0x338   :  { %975 = vmatpush3.msra.mxu0 %v1107_v7 }
 0x339   :  { %976 = vmatprep.subr.mxu0 %v1036_v0 }
 0x33a   :  { %977 = vmatpush3.msra.mxu0 %v1116_v8 }
 0x33b   :  { %978 = vmatprep.subr.mxu0 %v1036_v0 }
 0x33c   :  { %979 = vmatpush3.msra.mxu0 %v1125_v9 }
 0x33d   :  { %980 = vmatprep.subr.mxu0 %v1036_v0 }
 0x33e   :  { %981 = vmatpush3.msra.mxu0 %v1134_v11 }
 0x33f   :  { %982 = vmatprep.subr.mxu0 %v1036_v0 }
 0x340   :  { %983 = vmatpush3.msra.mxu0 %v1146_v12 }
 0x341   :  { %984 = vmatprep.subr.mxu0 %v1036_v0 }
 0x342   :  { %985 = vmatpush3.msra.mxu0 %v1155_v13 }
 0x343   :  { %986 = vmatprep.subr.mxu0 %v1036_v0 }
 0x344   :  { %987 = vmatpush3.msra.mxu0 %v1164_v14 }
 0x345   :  { %988 = vmatprep.subr.mxu0 %v1036_v0 }
 0x346   :  { %989 = vmatpush3.msra.mxu0 %v1173_v15 }
 0x347   :  { %990 = vmatprep.subr.mxu0 %v1036_v0 }
 0x348   :  { %991 = vmatpush3.msra.mxu0 %v1182_v16 }
 0x349   :  { %992 = vmatprep.subr.mxu0 %v1036_v0 }
 0x34a   :  { %993 = vmatpush3.msra.mxu0 %v1191_v17 }
 0x34b   :  { %994 = vmatprep.subr.mxu0 %v1036_v0 }
 0x34c   :  { %995 = vmatpush3.msra.mxu0 %v1200_v18 }
 0x3ed   :  { %v393_v36 = vpop.f32.mrf.mxu0 }
 0x3ee   :  { %v394_v37 = vadd.f32 %v393_v36, %v326_v35 }
 0x3ef   :  { %v928_v38 = vpop.f32.mrf.mxu0 }
 0x3f0   :  { %397 = vst [vmem:[%s1463_s3 + $0x5] sm:$0x1] %v394_v37  ;;  %962 = vmatmul.mubr.f32.vlgmr.msra.gmra.mxu1 %v394_v37 }
 0x3f1   :  { %1000 = vmatpush3.msra.mxu1 %v1062_v1  ;;  %1031 = vmatprep.mubr.msk.f32.mxu1 %vm1037_vm0, %v1036_v0 }
 0x3f2   :  { %1001 = vmatprep.subr.mxu1 %v1036_v0 }
 0x3f3   :  { %1002 = vmatpush3.msra.mxu1 %v1067_v2 }
 0x3f4   :  { %1003 = vmatprep.subr.mxu1 %v1036_v0 }
 0x3f5   :  { %1004 = vmatpush3.msra.mxu1 %v1077_v3 }
 0x3f6   :  { %1005 = vmatprep.subr.mxu1 %v1036_v0 }
 0x3f7   :  { %1006 = vmatpush3.msra.mxu1 %v1086_v4 }
 0x3f8   :  { %1007 = vmatprep.subr.mxu1 %v1036_v0 }
 0x3f9   :  { %1008 = vmatpush3.msra.mxu1 %v1098_v6 }
 0x3fa   :  { %1009 = vmatprep.subr.mxu1 %v1036_v0 }
 0x3fb   :  { %1010 = vmatpush3.msra.mxu1 %v1107_v7 }
 0x3fc   :  { %1011 = vmatprep.subr.mxu1 %v1036_v0 }
 0x3fd   :  { %1012 = vmatpush3.msra.mxu1 %v1116_v8 }
 0x3fe   :  { %1013 = vmatprep.subr.mxu1 %v1036_v0 }
 0x3ff   :  { %1014 = vmatpush3.msra.mxu1 %v1125_v9 }
 0x400   :  { %1015 = vmatprep.subr.mxu1 %v1036_v0 }
 0x401   :  { %1016 = vmatpush3.msra.mxu1 %v1134_v11 }
 0x402   :  { %1017 = vmatprep.subr.mxu1 %v1036_v0 }
 0x403   :  { %1018 = vmatpush3.msra.mxu1 %v1146_v12 }
 0x404   :  { %1019 = vmatprep.subr.mxu1 %v1036_v0 }
 0x405   :  { %1020 = vmatpush3.msra.mxu1 %v1155_v13 }
 0x406   :  { %1021 = vmatprep.subr.mxu1 %v1036_v0 }
 0x407   :  { %1022 = vmatpush3.msra.mxu1 %v1164_v14 }
 0x408   :  { %1023 = vmatprep.subr.mxu1 %v1036_v0 }
 0x409   :  { %1024 = vmatpush3.msra.mxu1 %v1173_v15 }
 0x40a   :  { %1025 = vmatprep.subr.mxu1 %v1036_v0 }
 0x40b   :  { %1026 = vmatpush3.msra.mxu1 %v1182_v16 }
 0x40c   :  { %1027 = vmatprep.subr.mxu1 %v1036_v0 }
 0x40d   :  { %1028 = vmatpush3.msra.mxu1 %v1191_v17 }
 0x40e   :  { %1029 = vmatprep.subr.mxu1 %v1036_v0 }
 0x40f   :  { %1030 = vmatpush3.msra.mxu1 %v1200_v18 }
 0x4b0   :  { %v465_v40 = vpop.f32.mrf.mxu1 }
 0x4b1   :  { %v466_v41 = vadd.f32 %v465_v40, %v398_v39 }
 0x4b2   :  { %v963_v42 = vpop.f32.mrf.mxu1 }
 0x4b3   :  { %469 = vst [vmem:[%s1463_s3 + $0x6] sm:$0x1] %v466_v41  ;;  %997 = vmatmul.mubr.f32.vlgmr.msra.gmra.mxu0 %v466_v41 }
 0x573   :  { %v537_v44 = vpop.f32.mrf.mxu0 }
 0x574   :  { %v538_v45 = vadd.f32 %v537_v44, %v470_v43 }
 0x575   :  { %v998_v46 = vpop.f32.mrf.mxu0 }
 0x576   :  { %541 = vst [vmem:[%s1463_s3 + $0x7] sm:$0x1] %v538_v45  ;;  %1032 = vmatmul.mubr.f32.vlgmr.msra.gmra.mxu1 %v538_v45 }
 0x636   :  { %v609_v48 = vpop.f32.mrf.mxu1 }
 0x637   :  { %v610_v49 = vadd.f32 %v609_v48, %v542_v47 }
 0x638   :  { %v1033_v50 = vpop.f32.mrf.mxu1 }
 0x639   :  { %613 = vst [vmem:[#allocation2] sm:$0x1] %v610_v49 }

</bundles_post_ra>
